<compile_context>
chip_gen: v5e
topology: v5e:2x2
jax: 0.10.0
libtpu: 0.0.40
codegen_flags: <defaults>
</compile_context>

<pallas_src>
import functools

import jax
import jax.numpy as jnp
from jax import lax
from jax.experimental import pallas as pl
from jax.experimental.pallas import tpu as pltpu

# ---------------- model hyper-parameters (small, synthetic) ----------------
NUM_HEADS = 4
D_MODEL = 32
D_K = 8
D_V = 8
D_FF = 64
BATCH = 2
SEQ = 8
LN_EPS = 1e-5

# Lane-padded sizes: last dim of every major tensor is a full 128-lane group.
DP = 128     # padded d_model
FP = 128     # padded d_ff
QKVP = 128   # padded fused [q|k|v] projection width (3*32 real + 32 zero pad)


def encoder_layer_kernel(x_ref, w_ref, wo_ref, vec_ref, o_ref, *,
                         num_heads, d_k, d_v, d_model, batch, seq):
    B, S, H = batch, seq, num_heads
    HK = H * d_k
    HV = H * d_v
    inv_d = 1.0 / d_model

    x = x_ref[...]                                    # (B*S, DP) f32, pad lanes are 0
    xb = x.astype(jnp.bfloat16)

    # ---- fused QKV projection (1/sqrt(d_k) folded into W_q at prep time) ----
    qkv = jnp.dot(xb, w_ref[0], preferred_element_type=jnp.float32)    # (B*S, 128)
    q = qkv[:, :HK].reshape(B, S, HK)
    k = qkv[:, HK:2 * HK].reshape(B, S, HK)
    v = qkv[:, 2 * HK:2 * HK + HV].reshape(B, S, HV)

    # ---- per-head attention (static loop; f32 on the tiny score/ctx matmuls) ----
    ctx_parts = []
    for h in range(H):
        qh = q[:, :, h * d_k:(h + 1) * d_k]           # (B, S, d_k)
        kh = k[:, :, h * d_k:(h + 1) * d_k]
        vh = v[:, :, h * d_v:(h + 1) * d_v]
        # batched q @ k^T without an explicit transpose (contract last dims)
        s = lax.dot_general(qh, kh,
                            dimension_numbers=(((2,), (2,)), ((0,), (0,))),
                            preferred_element_type=jnp.float32)        # (B, S, S)
        s = s - jnp.max(s, axis=-1, keepdims=True)
        p = jnp.exp(s)
        # softmax divide via EUP reciprocal (frees VALU slots)
        p = p * pl.reciprocal(jnp.sum(p, axis=-1, keepdims=True), approx=True)
        ctx_parts.append(lax.dot_general(
            p, vh, dimension_numbers=(((2,), (1,)), ((0,), (0,))),
            preferred_element_type=jnp.float32))                       # (B, S, d_v)

    # concat heads along lanes, then ONE lane-dense W_o matmul (no accumulator)
    ctx = jnp.concatenate(ctx_parts, axis=-1).reshape(B * S, HV)       # (B*S, 32)
    attn = jnp.dot(ctx.astype(jnp.bfloat16), wo_ref[...],
                   preferred_element_type=jnp.float32)                 # (B*S, DP), pad 0

    # fused small-vector operands: rows = [b1, b2, g1, be1, g2, be2, 0, 0]
    vecs = vec_ref[...]                                                # (8, DP) f32
    b1, b2 = vecs[0:1], vecs[1:2]
    g1, be1 = vecs[2:3], vecs[3:4]
    g2, be2 = vecs[4:5], vecs[5:6]

    # ---- residual + LayerNorm 1 (explicit /d_model so pad lanes don't bias stats) ----
    h1 = attn + x                                      # pad lanes stay 0
    mu1 = jnp.sum(h1, axis=-1, keepdims=True) * inv_d
    var1 = jnp.sum(h1 * h1, axis=-1, keepdims=True) * inv_d - mu1 * mu1
    h1n = (h1 - mu1) * lax.rsqrt(var1 + LN_EPS)
    h1n = h1n * g1 + be1                               # zero-padded gamma/beta -> pad lanes 0

    # ---- position-wise feed forward (bf16 operands, f32 accumulate) ----
    f = jnp.dot(h1n.astype(jnp.bfloat16), w_ref[1],
                preferred_element_type=jnp.float32) + b1
    f = jnp.maximum(f, 0.0)                            # ReLU
    f = jnp.dot(f.astype(jnp.bfloat16), w_ref[2],
                preferred_element_type=jnp.float32) + b2

    # ---- residual + LayerNorm 2 ----
    h2 = f + h1n
    mu2 = jnp.sum(h2, axis=-1, keepdims=True) * inv_d
    var2 = jnp.sum(h2 * h2, axis=-1, keepdims=True) * inv_d - mu2 * mu2
    h2n = (h2 - mu2) * lax.rsqrt(var2 + LN_EPS)
    # single lane-dense (16,128) unmasked store
    o_ref[...] = (h2n * g2 + be2).astype(o_ref.dtype)


def encoder_layer(x, kparams):
    """x: (B, S, D_MODEL) float32.  kparams: see prepare_kernel_params."""
    B, S, D = x.shape
    # lane-pad the activation slab to a full 128-lane group (layout plumbing)
    x2 = jnp.pad(x.reshape(B * S, D), ((0, 0), (0, DP - D)))

    w_stack = kparams["w_stack"]       # (3, 128, 128) bf16: [W_qkv, W1, W2]
    wo = kparams["wo"]                 # (32, 128) bf16
    vecs = kparams["vecs"]             # (8, 128) f32

    kernel = functools.partial(encoder_layer_kernel,
                               num_heads=NUM_HEADS, d_k=D_K, d_v=D_V,
                               d_model=D_MODEL, batch=B, seq=S)

    # Single grid step: the whole padded problem (< 200 KiB) fits in VMEM.
    out2 = pl.pallas_call(
        kernel,
        out_shape=jax.ShapeDtypeStruct((B * S, DP), x.dtype),
        grid_spec=pltpu.PrefetchScalarGridSpec(
            num_scalar_prefetch=0,
            grid=(1,),
            in_specs=[
                pl.BlockSpec((B * S, DP), lambda i: (0, 0)),     # activations
                pl.BlockSpec(w_stack.shape, lambda i: (0, 0, 0)),
                pl.BlockSpec(wo.shape, lambda i: (0, 0)),
                pl.BlockSpec(vecs.shape, lambda i: (0, 0)),
            ],
            out_specs=pl.BlockSpec((B * S, DP), lambda i: (0, 0)),
        ),
        compiler_params=pltpu.CompilerParams(
            dimension_semantics=("arbitrary",)),
    )(x2, w_stack, wo, vecs)
    # slice the real d_model lanes back out in the wrapper
    return out2[:, :D].reshape(B, S, D)


def make_params(key):
    """Deterministic synthetic parameters (PyTorch-equivalent, stored as (in, out))."""
    ks = jax.random.split(key, 8)
    scale = 0.1
    return {
        "wq": scale * jax.random.normal(ks[0], (D_MODEL, NUM_HEADS * D_K), jnp.float32),
        "wk": scale * jax.random.normal(ks[1], (D_MODEL, NUM_HEADS * D_K), jnp.float32),
        "wv": scale * jax.random.normal(ks[2], (D_MODEL, NUM_HEADS * D_V), jnp.float32),
        "wo": scale * jax.random.normal(ks[3], (NUM_HEADS * D_V, D_MODEL), jnp.float32),
        "w1": scale * jax.random.normal(ks[4], (D_MODEL, D_FF), jnp.float32),
        "b1": scale * jax.random.normal(ks[5], (1, D_FF), jnp.float32),
        "w2": scale * jax.random.normal(ks[6], (D_FF, D_MODEL), jnp.float32),
        "b2": scale * jax.random.normal(ks[7], (1, D_MODEL), jnp.float32),
        # LayerNorm affine params (PyTorch default init: gamma=1, beta=0)
        "g1": jnp.ones((1, D_MODEL), jnp.float32),
        "be1": jnp.zeros((1, D_MODEL), jnp.float32),
        "g2": jnp.ones((1, D_MODEL), jnp.float32),
        "be2": jnp.zeros((1, D_MODEL), jnp.float32),
    }


def prepare_kernel_params(p):
    """One-time parameter transform:
       - fuse W_q/W_k/W_v (scale folded into W_q) into one lane-padded weight,
       - zero-pad every weight/vector to 128 lanes,
       - stack W_qkv/W1/W2 into one bf16 slab and the six small vectors into
         one f32 slab (4 kernel operands total)."""
    HK, HV = NUM_HEADS * D_K, NUM_HEADS * D_V
    scale = 1.0 / (D_K ** 0.5)

    w_qkv = jnp.zeros((DP, QKVP), jnp.float32)
    w_qkv = w_qkv.at[:D_MODEL, :HK].set(p["wq"] * scale)
    w_qkv = w_qkv.at[:D_MODEL, HK:2 * HK].set(p["wk"])
    w_qkv = w_qkv.at[:D_MODEL, 2 * HK:2 * HK + HV].set(p["wv"])

    w1 = jnp.zeros((DP, FP), jnp.float32).at[:D_MODEL, :D_FF].set(p["w1"])
    w2 = jnp.zeros((FP, DP), jnp.float32).at[:D_FF, :D_MODEL].set(p["w2"])
    w_stack = jnp.stack([w_qkv, w1, w2]).astype(jnp.bfloat16)       # (3, 128, 128)

    wo = (jnp.zeros((HV, DP), jnp.float32)
          .at[:, :D_MODEL].set(p["wo"]).astype(jnp.bfloat16))        # (32, 128)

    vecs = jnp.zeros((8, DP), jnp.float32)
    vecs = vecs.at[0, :D_FF].set(p["b1"][0])
    vecs = vecs.at[1, :D_MODEL].set(p["b2"][0])
    vecs = vecs.at[2, :D_MODEL].set(p["g1"][0])
    vecs = vecs.at[3, :D_MODEL].set(p["be1"][0])
    vecs = vecs.at[4, :D_MODEL].set(p["g2"][0])
    vecs = vecs.at[5, :D_MODEL].set(p["be2"][0])

    return {"w_stack": w_stack, "wo": wo, "vecs": vecs}


def encoder_layer_ref(x, p):
    """Pure-JAX f32 reference mirroring the PyTorch forward (raw, unscaled weights)."""
    B, S, D = x.shape
    q = (x @ p["wq"]).reshape(B, S, NUM_HEADS, D_K).transpose(0, 2, 1, 3)
    k = (x @ p["wk"]).reshape(B, S, NUM_HEADS, D_K).transpose(0, 2, 1, 3)
    v = (x @ p["wv"]).reshape(B, S, NUM_HEADS, D_V).transpose(0, 2, 1, 3)
    s = jnp.einsum("bhqd,bhkd->bhqk", q, k) / (D_K ** 0.5)
    a = jax.nn.softmax(s, axis=-1)
    o = jnp.einsum("bhqk,bhkd->bhqd", a, v).transpose(0, 2, 1, 3).reshape(B, S, NUM_HEADS * D_V)
    o = o @ p["wo"]
    h1 = o + x
    mu = h1.mean(-1, keepdims=True)
    var = ((h1 - mu) ** 2).mean(-1, keepdims=True)
    h1n = (h1 - mu) / jnp.sqrt(var + LN_EPS) * p["g1"][0] + p["be1"][0]
    f = jnp.maximum(h1n @ p["w1"] + p["b1"][0], 0.0) @ p["w2"] + p["b2"][0]
    h2 = f + h1n
    mu2 = h2.mean(-1, keepdims=True)
    var2 = ((h2 - mu2) ** 2).mean(-1, keepdims=True)
    return (h2 - mu2) / jnp.sqrt(var2 + LN_EPS) * p["g2"][0] + p["be2"][0]


if __name__ == "__main__":
    key = jax.random.PRNGKey(0)
    kx, kp = jax.random.split(key)
    x = jax.random.normal(kx, (BATCH, SEQ, D_MODEL), jnp.float32)
    params = make_params(kp)
    kparams = prepare_kernel_params(params)

    out = jax.block_until_ready(encoder_layer(x, kparams))

    ref = encoder_layer_ref(x, params)
    assert out.shape == (BATCH, SEQ, D_MODEL)
    # Tolerance reflects bf16 matmul operands (unit roundoff ~2^-8) plus the
    # EUP approximate reciprocal in the softmax, compared against a pure-f32
    # reference; observed deviations are ~1e-2 on O(1) LayerNorm outputs.
    assert jnp.allclose(out, ref, atol=5e-2, rtol=5e-2), "mismatch vs reference"
    print("KERNEL_OK")
</pallas_src>

<mosaic_0001>
module attributes {stable_mosaic.version = 11 : i64} {
  func.func @encoder_layer_kernel(%arg0: i32, %arg1: memref<16x128xf32, #tpu.memory_space<vmem>>, %arg2: memref<3x128x128xbf16, #tpu.memory_space<vmem>>, %arg3: memref<32x128xbf16, #tpu.memory_space<vmem>>, %arg4: memref<8x128xf32, #tpu.memory_space<vmem>>, %arg5: memref<16x128xf32, #tpu.memory_space<vmem>>) attributes {dimension_semantics = [#tpu.dimension_semantics<arbitrary>], iteration_bounds = array<i64: 1>, scalar_prefetch = 0 : i64, scratch_operands = 0 : i64, tpu.core_type = #tpu.core_type<tc>, window_params = [{pipeline_mode = #tpu.pipeline_mode<synchronous>, transform_indices = @transform_0, window_bounds = array<i64: 16, 128>}, {pipeline_mode = #tpu.pipeline_mode<synchronous>, transform_indices = @transform_1, window_bounds = array<i64: 3, 128, 128>}, {pipeline_mode = #tpu.pipeline_mode<synchronous>, transform_indices = @transform_2, window_bounds = array<i64: 32, 128>}, {pipeline_mode = #tpu.pipeline_mode<synchronous>, transform_indices = @transform_3, window_bounds = array<i64: 8, 128>}, {pipeline_mode = #tpu.pipeline_mode<synchronous>, transform_indices = @transform_4, window_bounds = array<i64: 16, 128>}]} {
    %c0 = arith.constant 0 : index
    %c0_0 = arith.constant 0 : index
    %0 = vector.load %arg1[%c0, %c0_0] : memref<16x128xf32, #tpu.memory_space<vmem>>, vector<16x128xf32>
    %1 = arith.truncf %0 : vector<16x128xf32> to vector<16x128xbf16>
    %c0_1 = arith.constant 0 : index
    %c0_2 = arith.constant 0 : index
    %c0_3 = arith.constant 0 : index
    %2 = vector.load %arg2[%c0_1, %c0_2, %c0_3] : memref<3x128x128xbf16, #tpu.memory_space<vmem>>, vector<1x128x128xbf16>
    %3 = vector.shape_cast %2 : vector<1x128x128xbf16> to vector<128x128xbf16>
    %cst = arith.constant dense<0.000000e+00> : vector<16x128xf32>
    %4 = tpu.matmul %1, %3, %cst {dimension_numbers = #tpu.dot_dimension_numbers<[1], [0], [0], [1], [0, 0, 1, 1], [], []>} : vector<16x128xbf16>, vector<128x128xbf16>, vector<16x128xf32> -> vector<16x128xf32>
    %5 = vector.extract_strided_slice %4 {offsets = [0, 0], sizes = [16, 32], strides = [1, 1]} : vector<16x128xf32> to vector<16x32xf32>
    %6 = vector.shape_cast %5 : vector<16x32xf32> to vector<2x8x32xf32>
    %7 = vector.extract_strided_slice %4 {offsets = [0, 32], sizes = [16, 32], strides = [1, 1]} : vector<16x128xf32> to vector<16x32xf32>
    %8 = vector.shape_cast %7 : vector<16x32xf32> to vector<2x8x32xf32>
    %9 = vector.extract_strided_slice %4 {offsets = [0, 64], sizes = [16, 32], strides = [1, 1]} : vector<16x128xf32> to vector<16x32xf32>
    %10 = vector.shape_cast %9 : vector<16x32xf32> to vector<2x8x32xf32>
    %11 = vector.extract_strided_slice %6 {offsets = [0, 0, 0], sizes = [2, 8, 8], strides = [1, 1, 1]} : vector<2x8x32xf32> to vector<2x8x8xf32>
    %12 = vector.extract_strided_slice %8 {offsets = [0, 0, 0], sizes = [2, 8, 8], strides = [1, 1, 1]} : vector<2x8x32xf32> to vector<2x8x8xf32>
    %13 = vector.extract_strided_slice %10 {offsets = [0, 0, 0], sizes = [2, 8, 8], strides = [1, 1, 1]} : vector<2x8x32xf32> to vector<2x8x8xf32>
    %cst_4 = arith.constant dense<0.000000e+00> : vector<2x8x8xf32>
    %14 = tpu.matmul %11, %12, %cst_4 {dimension_numbers = #tpu.dot_dimension_numbers<[2], [2], [1], [1], [0, 0, 0, 1, 1, 1], [0], [0]>} : vector<2x8x8xf32>, vector<2x8x8xf32>, vector<2x8x8xf32> -> vector<2x8x8xf32>
    %cst_5 = arith.constant dense<0xFF800000> : vector<2x8xf32>
    %15 = vector.multi_reduction <maximumf>, %14, %cst_5 [2] : vector<2x8x8xf32> to vector<2x8xf32>
    %16 = vector.shape_cast %15 : vector<2x8xf32> to vector<2x8x1xf32>
    %17 = vector.broadcast %16 : vector<2x8x1xf32> to vector<2x8x8xf32>
    %18 = arith.subf %14, %17 : vector<2x8x8xf32>
    %19 = math.exp %18 : vector<2x8x8xf32>
    %cst_6 = arith.constant dense<0.000000e+00> : vector<2x8xf32>
    %20 = vector.multi_reduction <add>, %19, %cst_6 [2] : vector<2x8x8xf32> to vector<2x8xf32>
    %21 = vector.shape_cast %20 : vector<2x8xf32> to vector<2x8x1xf32>
    %22 = tpu.reciprocal %21 {approx = true} : vector<2x8x1xf32> -> vector<2x8x1xf32>
    %23 = vector.broadcast %22 : vector<2x8x1xf32> to vector<2x8x8xf32>
    %24 = arith.mulf %19, %23 : vector<2x8x8xf32>
    %cst_7 = arith.constant dense<0.000000e+00> : vector<2x8x8xf32>
    %25 = tpu.matmul %24, %13, %cst_7 {dimension_numbers = #tpu.dot_dimension_numbers<[2], [1], [1], [2], [0, 0, 0, 1, 1, 2], [0], [0]>} : vector<2x8x8xf32>, vector<2x8x8xf32>, vector<2x8x8xf32> -> vector<2x8x8xf32>
    %26 = vector.extract_strided_slice %6 {offsets = [0, 0, 8], sizes = [2, 8, 8], strides = [1, 1, 1]} : vector<2x8x32xf32> to vector<2x8x8xf32>
    %27 = vector.extract_strided_slice %8 {offsets = [0, 0, 8], sizes = [2, 8, 8], strides = [1, 1, 1]} : vector<2x8x32xf32> to vector<2x8x8xf32>
    %28 = vector.extract_strided_slice %10 {offsets = [0, 0, 8], sizes = [2, 8, 8], strides = [1, 1, 1]} : vector<2x8x32xf32> to vector<2x8x8xf32>
    %cst_8 = arith.constant dense<0.000000e+00> : vector<2x8x8xf32>
    %29 = tpu.matmul %26, %27, %cst_8 {dimension_numbers = #tpu.dot_dimension_numbers<[2], [2], [1], [1], [0, 0, 0, 1, 1, 1], [0], [0]>} : vector<2x8x8xf32>, vector<2x8x8xf32>, vector<2x8x8xf32> -> vector<2x8x8xf32>
    %cst_9 = arith.constant dense<0xFF800000> : vector<2x8xf32>
    %30 = vector.multi_reduction <maximumf>, %29, %cst_9 [2] : vector<2x8x8xf32> to vector<2x8xf32>
    %31 = vector.shape_cast %30 : vector<2x8xf32> to vector<2x8x1xf32>
    %32 = vector.broadcast %31 : vector<2x8x1xf32> to vector<2x8x8xf32>
    %33 = arith.subf %29, %32 : vector<2x8x8xf32>
    %34 = math.exp %33 : vector<2x8x8xf32>
    %cst_10 = arith.constant dense<0.000000e+00> : vector<2x8xf32>
    %35 = vector.multi_reduction <add>, %34, %cst_10 [2] : vector<2x8x8xf32> to vector<2x8xf32>
    %36 = vector.shape_cast %35 : vector<2x8xf32> to vector<2x8x1xf32>
    %37 = tpu.reciprocal %36 {approx = true} : vector<2x8x1xf32> -> vector<2x8x1xf32>
    %38 = vector.broadcast %37 : vector<2x8x1xf32> to vector<2x8x8xf32>
    %39 = arith.mulf %34, %38 : vector<2x8x8xf32>
    %cst_11 = arith.constant dense<0.000000e+00> : vector<2x8x8xf32>
    %40 = tpu.matmul %39, %28, %cst_11 {dimension_numbers = #tpu.dot_dimension_numbers<[2], [1], [1], [2], [0, 0, 0, 1, 1, 2], [0], [0]>} : vector<2x8x8xf32>, vector<2x8x8xf32>, vector<2x8x8xf32> -> vector<2x8x8xf32>
    %41 = vector.extract_strided_slice %6 {offsets = [0, 0, 16], sizes = [2, 8, 8], strides = [1, 1, 1]} : vector<2x8x32xf32> to vector<2x8x8xf32>
    %42 = vector.extract_strided_slice %8 {offsets = [0, 0, 16], sizes = [2, 8, 8], strides = [1, 1, 1]} : vector<2x8x32xf32> to vector<2x8x8xf32>
    %43 = vector.extract_strided_slice %10 {offsets = [0, 0, 16], sizes = [2, 8, 8], strides = [1, 1, 1]} : vector<2x8x32xf32> to vector<2x8x8xf32>
    %cst_12 = arith.constant dense<0.000000e+00> : vector<2x8x8xf32>
    %44 = tpu.matmul %41, %42, %cst_12 {dimension_numbers = #tpu.dot_dimension_numbers<[2], [2], [1], [1], [0, 0, 0, 1, 1, 1], [0], [0]>} : vector<2x8x8xf32>, vector<2x8x8xf32>, vector<2x8x8xf32> -> vector<2x8x8xf32>
    %cst_13 = arith.constant dense<0xFF800000> : vector<2x8xf32>
    %45 = vector.multi_reduction <maximumf>, %44, %cst_13 [2] : vector<2x8x8xf32> to vector<2x8xf32>
    %46 = vector.shape_cast %45 : vector<2x8xf32> to vector<2x8x1xf32>
    %47 = vector.broadcast %46 : vector<2x8x1xf32> to vector<2x8x8xf32>
    %48 = arith.subf %44, %47 : vector<2x8x8xf32>
    %49 = math.exp %48 : vector<2x8x8xf32>
    %cst_14 = arith.constant dense<0.000000e+00> : vector<2x8xf32>
    %50 = vector.multi_reduction <add>, %49, %cst_14 [2] : vector<2x8x8xf32> to vector<2x8xf32>
    %51 = vector.shape_cast %50 : vector<2x8xf32> to vector<2x8x1xf32>
    %52 = tpu.reciprocal %51 {approx = true} : vector<2x8x1xf32> -> vector<2x8x1xf32>
    %53 = vector.broadcast %52 : vector<2x8x1xf32> to vector<2x8x8xf32>
    %54 = arith.mulf %49, %53 : vector<2x8x8xf32>
    %cst_15 = arith.constant dense<0.000000e+00> : vector<2x8x8xf32>
    %55 = tpu.matmul %54, %43, %cst_15 {dimension_numbers = #tpu.dot_dimension_numbers<[2], [1], [1], [2], [0, 0, 0, 1, 1, 2], [0], [0]>} : vector<2x8x8xf32>, vector<2x8x8xf32>, vector<2x8x8xf32> -> vector<2x8x8xf32>
    %56 = vector.extract_strided_slice %6 {offsets = [0, 0, 24], sizes = [2, 8, 8], strides = [1, 1, 1]} : vector<2x8x32xf32> to vector<2x8x8xf32>
    %57 = vector.extract_strided_slice %8 {offsets = [0, 0, 24], sizes = [2, 8, 8], strides = [1, 1, 1]} : vector<2x8x32xf32> to vector<2x8x8xf32>
    %58 = vector.extract_strided_slice %10 {offsets = [0, 0, 24], sizes = [2, 8, 8], strides = [1, 1, 1]} : vector<2x8x32xf32> to vector<2x8x8xf32>
    %cst_16 = arith.constant dense<0.000000e+00> : vector<2x8x8xf32>
    %59 = tpu.matmul %56, %57, %cst_16 {dimension_numbers = #tpu.dot_dimension_numbers<[2], [2], [1], [1], [0, 0, 0, 1, 1, 1], [0], [0]>} : vector<2x8x8xf32>, vector<2x8x8xf32>, vector<2x8x8xf32> -> vector<2x8x8xf32>
    %cst_17 = arith.constant dense<0xFF800000> : vector<2x8xf32>
    %60 = vector.multi_reduction <maximumf>, %59, %cst_17 [2] : vector<2x8x8xf32> to vector<2x8xf32>
    %61 = vector.shape_cast %60 : vector<2x8xf32> to vector<2x8x1xf32>
    %62 = vector.broadcast %61 : vector<2x8x1xf32> to vector<2x8x8xf32>
    %63 = arith.subf %59, %62 : vector<2x8x8xf32>
    %64 = math.exp %63 : vector<2x8x8xf32>
    %cst_18 = arith.constant dense<0.000000e+00> : vector<2x8xf32>
    %65 = vector.multi_reduction <add>, %64, %cst_18 [2] : vector<2x8x8xf32> to vector<2x8xf32>
    %66 = vector.shape_cast %65 : vector<2x8xf32> to vector<2x8x1xf32>
    %67 = tpu.reciprocal %66 {approx = true} : vector<2x8x1xf32> -> vector<2x8x1xf32>
    %68 = vector.broadcast %67 : vector<2x8x1xf32> to vector<2x8x8xf32>
    %69 = arith.mulf %64, %68 : vector<2x8x8xf32>
    %cst_19 = arith.constant dense<0.000000e+00> : vector<2x8x8xf32>
    %70 = tpu.matmul %69, %58, %cst_19 {dimension_numbers = #tpu.dot_dimension_numbers<[2], [1], [1], [2], [0, 0, 0, 1, 1, 2], [0], [0]>} : vector<2x8x8xf32>, vector<2x8x8xf32>, vector<2x8x8xf32> -> vector<2x8x8xf32>
    %71 = tpu.concatenate %25, %40, %55, %70 in 2 : vector<2x8x8xf32>, vector<2x8x8xf32>, vector<2x8x8xf32>, vector<2x8x8xf32> -> vector<2x8x32xf32>
    %72 = vector.shape_cast %71 : vector<2x8x32xf32> to vector<16x32xf32>
    %73 = arith.truncf %72 : vector<16x32xf32> to vector<16x32xbf16>
    %c0_20 = arith.constant 0 : index
    %c0_21 = arith.constant 0 : index
    %74 = vector.load %arg3[%c0_20, %c0_21] : memref<32x128xbf16, #tpu.memory_space<vmem>>, vector<32x128xbf16>
    %cst_22 = arith.constant dense<0.000000e+00> : vector<16x128xf32>
    %75 = tpu.matmul %73, %74, %cst_22 {dimension_numbers = #tpu.dot_dimension_numbers<[1], [0], [0], [1], [0, 0, 1, 1], [], []>} : vector<16x32xbf16>, vector<32x128xbf16>, vector<16x128xf32> -> vector<16x128xf32>
    %c0_23 = arith.constant 0 : index
    %c0_24 = arith.constant 0 : index
    %76 = vector.load %arg4[%c0_23, %c0_24] : memref<8x128xf32, #tpu.memory_space<vmem>>, vector<8x128xf32>
    %77 = vector.extract_strided_slice %76 {offsets = [0, 0], sizes = [1, 128], strides = [1, 1]} : vector<8x128xf32> to vector<1x128xf32>
    %78 = vector.extract_strided_slice %76 {offsets = [1, 0], sizes = [1, 128], strides = [1, 1]} : vector<8x128xf32> to vector<1x128xf32>
    %79 = vector.extract_strided_slice %76 {offsets = [2, 0], sizes = [1, 128], strides = [1, 1]} : vector<8x128xf32> to vector<1x128xf32>
    %80 = vector.extract_strided_slice %76 {offsets = [3, 0], sizes = [1, 128], strides = [1, 1]} : vector<8x128xf32> to vector<1x128xf32>
    %81 = vector.extract_strided_slice %76 {offsets = [4, 0], sizes = [1, 128], strides = [1, 1]} : vector<8x128xf32> to vector<1x128xf32>
    %82 = vector.extract_strided_slice %76 {offsets = [5, 0], sizes = [1, 128], strides = [1, 1]} : vector<8x128xf32> to vector<1x128xf32>
    %83 = arith.addf %75, %0 : vector<16x128xf32>
    %cst_25 = arith.constant dense<0.000000e+00> : vector<16xf32>
    %84 = vector.multi_reduction <add>, %83, %cst_25 [1] : vector<16x128xf32> to vector<16xf32>
    %85 = vector.shape_cast %84 : vector<16xf32> to vector<16x1xf32>
    %cst_26 = arith.constant 3.125000e-02 : f32
    %86 = vector.broadcast %cst_26 : f32 to vector<16x1xf32>
    %87 = arith.mulf %85, %86 : vector<16x1xf32>
    %88 = arith.mulf %83, %83 : vector<16x128xf32>
    %cst_27 = arith.constant dense<0.000000e+00> : vector<16xf32>
    %89 = vector.multi_reduction <add>, %88, %cst_27 [1] : vector<16x128xf32> to vector<16xf32>
    %90 = vector.shape_cast %89 : vector<16xf32> to vector<16x1xf32>
    %cst_28 = arith.constant 3.125000e-02 : f32
    %91 = vector.broadcast %cst_28 : f32 to vector<16x1xf32>
    %92 = arith.mulf %90, %91 : vector<16x1xf32>
    %93 = arith.mulf %87, %87 : vector<16x1xf32>
    %94 = arith.subf %92, %93 : vector<16x1xf32>
    %95 = vector.broadcast %87 : vector<16x1xf32> to vector<16x128xf32>
    %96 = arith.subf %83, %95 : vector<16x128xf32>
    %cst_29 = arith.constant 9.99999974E-6 : f32
    %97 = vector.broadcast %cst_29 : f32 to vector<16x1xf32>
    %98 = arith.addf %94, %97 : vector<16x1xf32>
    %99 = math.rsqrt %98 : vector<16x1xf32>
    %100 = vector.broadcast %99 : vector<16x1xf32> to vector<16x128xf32>
    %101 = arith.mulf %96, %100 : vector<16x128xf32>
    %102 = vector.broadcast %79 : vector<1x128xf32> to vector<16x128xf32>
    %103 = arith.mulf %101, %102 : vector<16x128xf32>
    %104 = vector.broadcast %80 : vector<1x128xf32> to vector<16x128xf32>
    %105 = arith.addf %103, %104 : vector<16x128xf32>
    %106 = arith.truncf %105 : vector<16x128xf32> to vector<16x128xbf16>
    %c1 = arith.constant 1 : index
    %c0_30 = arith.constant 0 : index
    %c0_31 = arith.constant 0 : index
    %107 = vector.load %arg2[%c1, %c0_30, %c0_31] : memref<3x128x128xbf16, #tpu.memory_space<vmem>>, vector<1x128x128xbf16>
    %108 = vector.shape_cast %107 : vector<1x128x128xbf16> to vector<128x128xbf16>
    %cst_32 = arith.constant dense<0.000000e+00> : vector<16x128xf32>
    %109 = tpu.matmul %106, %108, %cst_32 {dimension_numbers = #tpu.dot_dimension_numbers<[1], [0], [0], [1], [0, 0, 1, 1], [], []>} : vector<16x128xbf16>, vector<128x128xbf16>, vector<16x128xf32> -> vector<16x128xf32>
    %110 = vector.broadcast %77 : vector<1x128xf32> to vector<16x128xf32>
    %111 = arith.addf %109, %110 : vector<16x128xf32>
    %cst_33 = arith.constant 0.000000e+00 : f32
    %112 = vector.broadcast %cst_33 : f32 to vector<16x128xf32>
    %113 = arith.maximumf %111, %112 : vector<16x128xf32>
    %114 = arith.truncf %113 : vector<16x128xf32> to vector<16x128xbf16>
    %c2 = arith.constant 2 : index
    %c0_34 = arith.constant 0 : index
    %c0_35 = arith.constant 0 : index
    %115 = vector.load %arg2[%c2, %c0_34, %c0_35] : memref<3x128x128xbf16, #tpu.memory_space<vmem>>, vector<1x128x128xbf16>
    %116 = vector.shape_cast %115 : vector<1x128x128xbf16> to vector<128x128xbf16>
    %cst_36 = arith.constant dense<0.000000e+00> : vector<16x128xf32>
    %117 = tpu.matmul %114, %116, %cst_36 {dimension_numbers = #tpu.dot_dimension_numbers<[1], [0], [0], [1], [0, 0, 1, 1], [], []>} : vector<16x128xbf16>, vector<128x128xbf16>, vector<16x128xf32> -> vector<16x128xf32>
    %118 = vector.broadcast %78 : vector<1x128xf32> to vector<16x128xf32>
    %119 = arith.addf %117, %118 : vector<16x128xf32>
    %120 = arith.addf %119, %105 : vector<16x128xf32>
    %cst_37 = arith.constant dense<0.000000e+00> : vector<16xf32>
    %121 = vector.multi_reduction <add>, %120, %cst_37 [1] : vector<16x128xf32> to vector<16xf32>
    %122 = vector.shape_cast %121 : vector<16xf32> to vector<16x1xf32>
    %cst_38 = arith.constant 3.125000e-02 : f32
    %123 = vector.broadcast %cst_38 : f32 to vector<16x1xf32>
    %124 = arith.mulf %122, %123 : vector<16x1xf32>
    %125 = arith.mulf %120, %120 : vector<16x128xf32>
    %cst_39 = arith.constant dense<0.000000e+00> : vector<16xf32>
    %126 = vector.multi_reduction <add>, %125, %cst_39 [1] : vector<16x128xf32> to vector<16xf32>
    %127 = vector.shape_cast %126 : vector<16xf32> to vector<16x1xf32>
    %cst_40 = arith.constant 3.125000e-02 : f32
    %128 = vector.broadcast %cst_40 : f32 to vector<16x1xf32>
    %129 = arith.mulf %127, %128 : vector<16x1xf32>
    %130 = arith.mulf %124, %124 : vector<16x1xf32>
    %131 = arith.subf %129, %130 : vector<16x1xf32>
    %132 = vector.broadcast %124 : vector<16x1xf32> to vector<16x128xf32>
    %133 = arith.subf %120, %132 : vector<16x128xf32>
    %cst_41 = arith.constant 9.99999974E-6 : f32
    %134 = vector.broadcast %cst_41 : f32 to vector<16x1xf32>
    %135 = arith.addf %131, %134 : vector<16x1xf32>
    %136 = math.rsqrt %135 : vector<16x1xf32>
    %137 = vector.broadcast %136 : vector<16x1xf32> to vector<16x128xf32>
    %138 = arith.mulf %133, %137 : vector<16x128xf32>
    %139 = vector.broadcast %81 : vector<1x128xf32> to vector<16x128xf32>
    %140 = arith.mulf %138, %139 : vector<16x128xf32>
    %141 = vector.broadcast %82 : vector<1x128xf32> to vector<16x128xf32>
    %142 = arith.addf %140, %141 : vector<16x128xf32>
    %c0_42 = arith.constant 0 : index
    %c0_43 = arith.constant 0 : index
    %143 = vector.load %arg5[%c0_42, %c0_43] : memref<16x128xf32, #tpu.memory_space<vmem>>, vector<16x128xf32>
    tpu.vector_store %arg5[%c0_42, %c0_43], %142 {strides = array<i32>} : memref<16x128xf32, #tpu.memory_space<vmem>>, vector<16x128xf32>,
    return
  }
  func.func @transform_0(%arg0: i32) -> (i32, i32) {
    %c0_i32 = arith.constant 0 : i32
    %c0_i32_0 = arith.constant 0 : i32
    %c0_i32_1 = arith.constant 0 : i32
    return %c0_i32, %c0_i32_0 : i32, i32
  }
  func.func @transform_1(%arg0: i32) -> (i32, i32, i32) {
    %c0_i32 = arith.constant 0 : i32
    %c0_i32_0 = arith.constant 0 : i32
    %c0_i32_1 = arith.constant 0 : i32
    %c0_i32_2 = arith.constant 0 : i32
    return %c0_i32, %c0_i32_0, %c0_i32_1 : i32, i32, i32
  }
  func.func @transform_2(%arg0: i32) -> (i32, i32) {
    %c0_i32 = arith.constant 0 : i32
    %c0_i32_0 = arith.constant 0 : i32
    %c0_i32_1 = arith.constant 0 : i32
    return %c0_i32, %c0_i32_0 : i32, i32
  }
  func.func @transform_3(%arg0: i32) -> (i32, i32) {
    %c0_i32 = arith.constant 0 : i32
    %c0_i32_0 = arith.constant 0 : i32
    %c0_i32_1 = arith.constant 0 : i32
    return %c0_i32, %c0_i32_0 : i32, i32
  }
  func.func @transform_4(%arg0: i32) -> (i32, i32) {
    %c0_i32 = arith.constant 0 : i32
    %c0_i32_0 = arith.constant 0 : i32
    %c0_i32_1 = arith.constant 0 : i32
    return %c0_i32, %c0_i32_0 : i32, i32
  }
}

</mosaic_0001>

<bundles_post_ra>
// kernel: tpu_custom_call.1
= control target key start
LH: loop header
LB: loop body
LE: loop exit
PB: predicated region body
PF: predicated region fallthrough
CT: control target
= control target key end

     0   :  { %9 = vsyncpa [#allocation3], 0  ;;  %s1595_s0 = inlined_call_operand.hbm [shape: f32[16,128], index: 0, kind: input, shape index: {}]   ;;  %s1596_s1 = inlined_call_operand.hbm [shape: bf16[3,128,128], index: 1, kind: input, shape index: {}]   ;;  %s1597_s2 = inlined_call_operand.hbm [shape: bf16[32,128], index: 2, kind: input, shape index: {}]   ;;  %s1598_s3 = inlined_call_operand.hbm [shape: f32[8,128], index: 3, kind: input, shape index: {}]   ;;  %s1599_s4 = inlined_call_operand.hbm [shape: f32[16,128], index: 4, kind: output, shape index: {}]  }
   0x1   :  { %10 = vsyncpa [#allocation6], 0 }
   0x2   :  { %11 = vsyncpa [#allocation9], 0  ;;  %s30_s17 = sshll.u32 %s1596_s1, 4  ;;  %s31_s17 = int_to_ptr.hbm [resolvable:$true] %s30_s17 }
   0x3   :  { %12 = vsyncpa [#allocation4], 0  ;;  %s1411_s18 = smov [#allocation5]   ;;  %s17_s22 = sshll.u32 %s1595_s0, 4  ;;  %s18_s22 = int_to_ptr.hbm [resolvable:$true] %s17_s22 }
   0x4   :  { %s32_s19 = sshll.u32 %s1411_s18, 4  ;;  %s1412_s23 = smov 64   ;;  %s33_s19 = int_to_ptr.vmem [resolvable:$true] %s32_s19 }
   0x5   :  { %s1413_s24 = smov 4   ;;  %s1414_s25 = smov [#allocation2]  }
   0x6   :  { %38 = dma.hbm_to_vmem [thread:$0]  %s31_s17, 3072, %s33_s19, [#allocation6], %s1412_s23, %s1412_s23, %s1413_s24  }
   0x7   :  { %s19_s26 = sshll.u32 %s1414_s25, 4  ;;  %s1415_s27 = smov 128   ;;  %s20_s26 = int_to_ptr.vmem [resolvable:$true] %s19_s26 }
   0x8   :  { %s1416_s1 = smov 8   ;;  %s43_s30 = sshll.u32 %s1597_s2, 4  ;;  %s44_s30 = int_to_ptr.hbm [resolvable:$true] %s43_s30 }
   0x9   :  { %25 = dma.hbm_to_vmem [thread:$0]  %s18_s22, 256, %s20_s26, [#allocation3], %s1415_s27, %s1415_s27, %s1416_s1  }
   0xa   :  { %s1417_s0 = smov [#allocation7]   ;;  %s57_s8 = sshll.u32 %s1598_s3, 4  ;;  %s58_s8 = int_to_ptr.hbm [resolvable:$true] %s57_s8 }
   0xb   :  { %s45_s5 = sshll.u32 %s1417_s0, 4  ;;  %s1418_s9 = smov [#allocation8]   ;;  %s46_s5 = int_to_ptr.vmem [resolvable:$true] %s45_s5 }
   0xc   :  { %51 = dma.hbm_to_vmem [thread:$0]  %s44_s30, 256, %s46_s5, [#allocation6], %s1412_s23, %s1412_s23, %s1413_s24  }
   0xd   :  { %s59_s10 = sshll.u32 %s1418_s9, 4  ;;  %s60_s10 = int_to_ptr.vmem [resolvable:$true] %s59_s10 }
   0xe   :  { %62 = dma.hbm_to_vmem [thread:$0]  %s58_s8, 128, %s60_s10, [#allocation9]  }
   0xf   :  { %1403 = dma.done.wait [#allocation3], 256  }
  0x10   :  { %1404 = vsyncadd [#allocation3], 4294967040 }
  0x11   :  { %1405 = dma.done.wait [#allocation6], 3328  }
  0x12   :  { %1406 = vsyncadd [#allocation6], 4294963968 }
  0x13   :  { %1407 = dma.done.wait [#allocation9], 128  }
  0x14   :  { %1408 = vsyncadd [#allocation9], 4294967168  ;;  %v1173_v0 = vld [vmem:[#allocation5 + $0x38] sm:$0xff]  ;;  %v1172_v1 = vld [vmem:[#allocation5 + $0x30] sm:$0xff]  ;;  %s1419_s2 = smov 120   ;;  %s1420_s3 = smov 88  }
  0x15   :  { %147 = vmatpush.bf16.msra.mxu0 %v1173_v0  ;;  %v1171_v2 = vld [vmem:[#allocation5 + $0x28] sm:$0xff]  ;;  %v1170_v3 = vld [vmem:[#allocation5 + $0x20] sm:$0xff]  ;;  %v1169_v4 = vld [vmem:[#allocation5 + $0x18] sm:$0xff]  ;;  %s1421_s11 = smov 96   ;;  %s1422_s12 = smov 112   ;;  %vm164_vm0 = vcmask 64512  }
  0x16   :  { %v1168_v5 = vld [vmem:[#allocation5 + $0x10] sm:$0xff]  ;;  %v1167_v6 = vld [vmem:[#allocation5 + $0x8] sm:$0xff]  ;;  %v1166_v7 = vld [vmem:[#allocation5] sm:$0xff]  ;;  %s1423_s13 = smov 80   ;;  %s1424_s14 = smov 56   ;;  %vm706_vm1 = vcmask 130048  }
  0x17   :  { %v1476_v8 = vld [vmem:[#allocation2] sm:$0xff]  ;;  %v1478_v9 = vld [vmem:[#allocation2 + $0x8] sm:$0xff]  ;;  %s1425_s15 = smov 48   ;;  %s1426_s16 = smov 72   ;;  %vm709_vm2 = vcmask 195584   ;;  %vm730_vm3 = vcmask 261120  }
  0x18   :  { %v82_v10 = vpack.c.bf16 %v1478_v9, %v1476_v8  ;;  %s1427_s17 = smov 104   ;;  %s1428_s18 = smov 40  }
  0x19   :  { %148 = vmatpush.bf16.msra.mxu0 %v1172_v1  ;;  %s1429_s19 = smov 16   ;;  %s1430_s20 = smov 24  }
  0x1a   :  { %s1431_s21 = smov [#allocation10]   ;;  %s1022_s25 = sshll.u32 %s1599_s4, 4  ;;  %s1023_s25 = int_to_ptr.hbm [resolvable:$true] %s1022_s25 }
  0x1b   :  { %s1020_s22 = sshll.u32 %s1431_s21, 4  ;;  %s1021_s22 = int_to_ptr.vmem [resolvable:$true] %s1020_s22 }
  0x1d   :  { %149 = vmatpush.bf16.msra.mxu0 %v1171_v2 }
  0x21   :  { %150 = vmatpush.bf16.msra.mxu0 %v1170_v3 }
  0x25   :  { %151 = vmatpush.bf16.msra.mxu0 %v1169_v4 }
  0x29   :  { %152 = vmatpush.bf16.msra.mxu0 %v1168_v5 }
  0x2d   :  { %153 = vmatpush.bf16.msra.mxu0 %v1167_v6 }
  0x31   :  { %154 = vmatpush.bf16.msra.mxu0 %v1166_v7 }
  0x34   :  { %155 = vmatmul.bf16.vlgmr.msra.gmra.mxu0 %v82_v10 }
  0xb1   :  { %v1482_v11 = vpop.f32.mrf.mxu0 }
  0xb2   :  { %290 = vrot.lane.b32.xlu2 %v1482_v11, %s1419_s2  ;;  %292 = vrot.lane.b32.xlu1 %v1482_v11, %s1420_s3 }
  0xb3   :  { %162 = vrot.lane.b32.xlu0 %v1482_v11, %s1421_s11 }
  0xb9   :  { %v1487_v12 = vpop.f32.mrf.mxu0 }
  0xba   :  { %318 = vrot.lane.b32.xlu2 %v1487_v12, %s1419_s2  ;;  %320 = vrot.lane.b32.xlu1 %v1487_v12, %s1420_s3  ;;  %v1515_v31 = vpack.i.bf16 %v1487_v12, %v1482_v11 }
  0xbb   :  { %190 = vrot.lane.b32.xlu0 %v1487_v12, %s1421_s11 }
  0xc2   :  { %420 = vrot.lane.b32.xlu1 %v1482_v11, %s1422_s12 }
  0xc3   :  { %422 = vrot.lane.b32.xlu0 %v1482_v11, %s1423_s13 }
 0x10c   :  { %v291_v14 = vpop.permute.xlu2 %290 }
 0x114   :  { %v319_v18 = vpop.permute.xlu2 %318 }
 0x124   :  { %v293_v13 = vpop.permute.xlu1 %292 }
 0x125   :  { %v163_v15 = vpop.permute.xlu0 %162 }
 0x126   :  { %1069 = vmatpush.xpose.msk.msra.mxu1 %vm164_vm0, %v163_v15 }
 0x129   :  { %1070 = vmatmul.msk.f32.vlgmr.msra.gmra.mxu1 %vm164_vm0, %v1482_v11 }
 0x12a   :  { %1075 = vmatpush.xpose.msk.msrb.mxu1 %vm164_vm0, %v293_v13 }
 0x12c   :  { %v321_v16 = vpop.permute.xlu1 %320 }
 0x12d   :  { %v191_v17 = vpop.permute.xlu0 %190  ;;  %1077 = vmatpush.xpose.msk.msra.mxu2 %vm164_vm0, %v321_v16 }
 0x12e   :  { %1071 = vmatpush.xpose.msk.msra.mxu3 %vm164_vm0, %v191_v17 }
 0x130   :  { %1078 = vmatmul.msk.f32.vlgmr.msra.gmra.mxu2 %vm164_vm0, %v319_v18 }
 0x131   :  { %1072 = vmatmul.msk.f32.vlgmr.msra.gmra.mxu3 %vm164_vm0, %v1487_v12  ;;  %1076 = vmatmul.msk.f32.vlgmr.msrb.gmra.mxu1 %vm164_vm0, %v291_v14 }
 0x134   :  { %v421_v20 = vpop.permute.xlu1 %420 }
 0x135   :  { %v423_v19 = vpop.permute.xlu0 %422 }
 0x136   :  { %1081 = vmatpush.xpose.msk.msrb.mxu2 %vm164_vm0, %v423_v19 }
 0x139   :  { %1082 = vmatmul.msk.f32.vlgmr.msrb.gmra.mxu2 %vm164_vm0, %v421_v20 }
 0x1a6   :  { %v186_v21 = vpop.f32.mrf.mxu1 }
 0x1a7   :  { %v216_v22 = vsel %vm164_vm0, %v186_v21, -inf }
 0x1a8   :  { %217 = vmax.xlane.f32.xlu2 %v216_v22 }
 0x1ae   :  { %v315_v23 = vpop.f32.mrf.mxu1 }
 0x1af   :  { %v346_v24 = vsel %vm164_vm0, %v315_v23, -inf }
 0x1b0   :  { %347 = vmax.xlane.f32.xlu1 %v346_v24 }
 0x1b3   :  { %v343_v25 = vpop.f32.mrf.mxu2 }
 0x1b4   :  { %v213_v26 = vpop.f32.mrf.mxu3  ;;  %v349_v27 = vsel %vm164_vm0, %v343_v25, -inf }
 0x1b5   :  { %350 = vmax.xlane.f32.xlu2 %v349_v27  ;;  %v219_v28 = vsel %vm164_vm0, %v213_v26, -inf }
 0x1b6   :  { %220 = vmax.xlane.f32.xlu0 %v219_v28 }
 0x1bc   :  { %v445_v29 = vpop.f32.mrf.mxu2 }
 0x1bd   :  { %v476_v30 = vsel %vm164_vm0, %v445_v29, -inf }
 0x1be   :  { %477 = vmax.xlane.f32.xlu2 %v476_v30 }
 0x1c9   :  { %450 = vrot.lane.b32.xlu1 %v1487_v12, %s1423_s13 }
 0x1ca   :  { %1219 = vrot.lane.b32.xlu0 %v1515_v31, %s1424_s14 }
 0x1d2   :  { %498 = vrot.lane.b32.xlu0 %v1482_v11, %s1425_s15 }
 0x1d6   :  { %1214 = vrot.lane.b32.xlu2 %v1515_v31, %s1412_s23 }
 0x1de   :  { %448 = vrot.lane.b32.xlu2 %v1487_v12, %s1422_s12 }
 0x1e6   :  { %552 = vrot.lane.b32.xlu2 %v1482_v11, %s1426_s16 }
 0x1ee   :  { %580 = vrot.lane.b32.xlu2 %v1487_v12, %s1426_s16 }
 0x21b   :  { %v218_v32 = vpop.xlane.xlu2 %217 }
 0x21c   :  { %v222_v33 = vsub.f32 %v186_v21, %v218_v32 }
 0x21e   :  { %v224_v34 = vmul.f32 1.442695, %v222_v33 }
 0x220   :  { %1243 = vpow2.f32 %v224_v34 }
 0x223   :  { %v348_v35 = vpop.xlane.xlu1 %347 }
 0x224   :  { %v352_v36 = vsub.f32 %v315_v23, %v348_v35 }
 0x226   :  { %v1244_v37 = vpop.eup %1243  ;;  %v354_v38 = vmul.f32 1.442695, %v352_v36 }
 0x227   :  { %v228_v39 = vsel %vm164_vm0, %v1244_v37, 0.0 }
 0x228   :  { %1245 = vpow2.f32 %v354_v38  ;;  %229 = vadd.xlane.f32.xlu0 %v228_v39  ;;  %v351_v40 = vpop.xlane.xlu2 %350 }
 0x229   :  { %v221_v41 = vpop.xlane.xlu0 %220  ;;  %v353_v43 = vsub.f32 %v343_v25, %v351_v40 }
 0x22a   :  { %v223_v42 = vsub.f32 %v213_v26, %v221_v41 }
 0x22b   :  { %v356_v47 = vmul.f32 1.442695, %v353_v43 }
 0x22c   :  { %v226_v44 = vmul.f32 1.442695, %v223_v42 }
 0x22e   :  { %v1246_v45 = vpop.eup %1245  ;;  %1247 = vpow2.f32 %v226_v44 }
 0x22f   :  { %v358_v46 = vsel %vm164_vm0, %v1246_v45, 0.0  ;;  %1249 = vpow2.f32 %v356_v47 }
 0x230   :  { %359 = vadd.xlane.f32.xlu0 %v358_v46 }
 0x231   :  { %v478_v48 = vpop.xlane.xlu2 %477 }
 0x232   :  { %v482_v50 = vsub.f32 %v445_v29, %v478_v48 }
 0x234   :  { %v1248_v49 = vpop.eup %1247  ;;  %v484_v52 = vmul.f32 1.442695, %v482_v50 }
 0x235   :  { %v231_v51 = vsel %vm164_vm0, %v1248_v49, 0.0  ;;  %v1250_v54 = vpop.eup %1249 }
 0x236   :  { %232 = vadd.xlane.f32.xlu1 %v231_v51  ;;  %1251 = vpow2.f32 %v484_v52  ;;  %v361_v59 = vsel %vm164_vm0, %v1250_v54, 0.0 }
 0x239   :  { %v1215_v53 = vpop.permute.xlu2 %1214 }
 0x23a   :  { %v1217_v55 = vunpack.i.h.bf16 %v1215_v53  ;;  %v1216_v56 = vunpack.i.l.bf16 %v1215_v53 }
 0x23b   :  { %v451_v0 = vpop.permute.xlu1 %450 }
 0x23c   :  { %259 = vmatpush.msrb.mxu3 %v1216_v56  ;;  %v1220_v57 = vpop.permute.xlu0 %1219  ;;  %v1252_v60 = vpop.eup %1251 }
 0x23d   :  { %v1222_v58 = vunpack.i.h.bf16 %v1220_v57  ;;  %v488_v62 = vsel %vm164_vm0, %v1252_v60, 0.0  ;;  %v1221_v3 = vunpack.i.l.bf16 %v1220_v57 }
 0x23e   :  { %285 = vmatpush.msra.mxu3 %v1217_v55  ;;  %362 = vadd.xlane.f32.xlu1 %v361_v59 }
 0x23f   :  { %415 = vmatpush.msra.mxu1 %v1222_v58 }
 0x241   :  { %v449_v4 = vpop.permute.xlu2 %448 }
 0x244   :  { %550 = vrot.lane.b32.xlu0 %v1482_v11, %s1427_s17  ;;  %v499_v61 = vpop.permute.xlu0 %498 }
 0x245   :  { %519 = vmatpush.msrb.mxu1 %v499_v61 }
 0x246   :  { %489 = vadd.xlane.f32.xlu1 %v488_v62 }
 0x249   :  { %v553_v10 = vpop.permute.xlu2 %552 }
 0x251   :  { %v581_v19 = vpop.permute.xlu2 %580 }
 0x25f   :  { %578 = vrot.lane.b32.xlu1 %v1487_v12, %s1427_s17 }
 0x29b   :  { %v230_v63 = vpop.xlane.xlu0 %229 }
 0x29c   :  { %1253 = vrcp.f32 %v230_v63 }
 0x2a2   :  { %v1254_v1 = vpop.eup %1253 }
 0x2a3   :  { %v236_v2 = vmul.f32 %v1254_v1, %v1244_v37  ;;  %v360_v6 = vpop.xlane.xlu0 %359 }
 0x2a5   :  { %1073 = vmatmul.msk.f32.vlgmr.msrb.gmra.mxu3 %vm164_vm0, %v236_v2 }
 0x2a6   :  { %389 = vmatpush.msrb.mxu3 %v1221_v3 }
 0x2a9   :  { %v233_v5 = vpop.xlane.xlu1 %232 }
 0x2aa   :  { %1255 = vrcp.f32 %v233_v5  ;;  %v1174_v5 = vld [vmem:[#allocation7] sm:$0xff] }
 0x2ab   :  { %1257 = vrcp.f32 %v360_v6 }
 0x2b0   :  { %v1256_v7 = vpop.eup %1255 }
 0x2b1   :  { %v237_v11 = vmul.f32 %v1256_v7, %v1248_v49  ;;  %v363_v13 = vpop.xlane.xlu1 %362  ;;  %v1258_v14 = vpop.eup %1257 }
 0x2b2   :  { %1259 = vrcp.f32 %v363_v13  ;;  %v366_v16 = vmul.f32 %v1258_v14, %v1246_v45 }
 0x2b3   :  { %1074 = vmatmul.msk.f32.vlgmr.msra.gmra.mxu3 %vm164_vm0, %v237_v11 }
 0x2b4   :  { %1083 = vmatpush.xpose.msk.msra.mxu3 %vm164_vm0, %v451_v0 }
 0x2b6   :  { %v551_v22 = vpop.permute.xlu0 %550 }
 0x2b8   :  { %v1260_v15 = vpop.eup %1259 }
 0x2b9   :  { %v367_v17 = vmul.f32 %v1260_v15, %v1250_v54  ;;  %v490_v18 = vpop.xlane.xlu1 %489 }
 0x2ba   :  { %1261 = vrcp.f32 %v490_v18 }
 0x2bb   :  { %1079 = vmatmul.msk.f32.vlgmr.msrb.gmra.mxu3 %vm164_vm0, %v366_v16  ;;  %1080 = vmatmul.msk.f32.vlgmr.msra.gmra.mxu1 %vm164_vm0, %v367_v17 }
 0x2bc   :  { %1087 = vmatpush.xpose.msk.msrb.mxu3 %vm164_vm0, %v553_v10  ;;  %1089 = vmatpush.xpose.msk.msra.mxu1 %vm164_vm0, %v581_v19 }
 0x2c0   :  { %v1262_v20 = vpop.eup %1261 }
 0x2c1   :  { %v496_v21 = vmul.f32 %v1262_v20, %v1252_v60 }
 0x2c3   :  { %1084 = vmatmul.msk.f32.vlgmr.msra.gmra.mxu3 %vm164_vm0, %v449_v4  ;;  %1085 = vmatmul.msk.f32.vlgmr.msrb.gmra.mxu1 %vm164_vm0, %v496_v21  ;;  %v1175_v4 = vld [vmem:[#allocation7 + $0x8] sm:$0xff] }
 0x2c4   :  { %740 = vmatpush.bf16.msrb.mxu1 %v1175_v4 }
 0x2c8   :  { %741 = vmatpush.bf16.msrb.mxu1 %v1174_v5 }
 0x2cb   :  { %1088 = vmatmul.msk.f32.vlgmr.msrb.gmra.mxu3 %vm164_vm0, %v551_v22 }
 0x2d1   :  { %v579_v23 = vpop.permute.xlu1 %578 }
 0x2d2   :  { %1090 = vmatmul.msk.f32.vlgmr.msra.gmra.mxu1 %vm164_vm0, %v579_v23 }
 0x328   :  { %v1546_v24 = vpop.f32.mrf.mxu3 }
 0x336   :  { %v1548_v25 = vpop.f32.mrf.mxu3 }
 0x338   :  { %v417_v26 = vpop.f32.mrf.mxu1 }
 0x33e   :  { %v391_v27 = vpop.f32.mrf.mxu3 }
 0x33f   :  { %v1228_v28 = vpack.i.bf16 %v417_v26, %v391_v27 }
 0x340   :  { %v521_v30 = vpop.f32.mrf.mxu1 }
 0x346   :  { %v473_v29 = vpop.f32.mrf.mxu3 }
 0x347   :  { %v479_v32 = vsel %vm164_vm0, %v473_v29, -inf }
 0x348   :  { %480 = vmax.xlane.f32.xlu0 %v479_v32  ;;  %v1183_v32 = vld [vmem:[#allocation5 + $0x78] sm:$0xff] }
 0x349   :  { %865 = vmatpush.bf16.msrb.mxu0 %v1183_v32 }
 0x34e   :  { %v575_v33 = vpop.f32.mrf.mxu3 }
 0x34f   :  { %v603_v34 = vpop.f32.mrf.mxu1  ;;  %v606_v35 = vsel %vm164_vm0, %v575_v33, -inf }
 0x350   :  { %607 = vmax.xlane.f32.xlu2 %v606_v35  ;;  %v609_v36 = vsel %vm164_vm0, %v603_v34, -inf  ;;  %v1179_v35 = vld [vmem:[#allocation5 + $0x58] sm:$0xff] }
 0x351   :  { %610 = vmax.xlane.f32.xlu1 %v609_v36  ;;  %v1178_v36 = vld [vmem:[#allocation5 + $0x50] sm:$0xff] }
 0x3bb   :  { %v481_v37 = vpop.xlane.xlu0 %480 }
 0x3bc   :  { %v483_v38 = vsub.f32 %v473_v29, %v481_v37 }
 0x3be   :  { %v486_v39 = vmul.f32 1.442695, %v483_v38 }
 0x3c0   :  { %1263 = vpow2.f32 %v486_v39  ;;  %v1177_v39 = vld [vmem:[#allocation5 + $0x48] sm:$0xff] }
 0x3c3   :  { %v608_v40 = vpop.xlane.xlu2 %607 }
 0x3c4   :  { %v612_v41 = vsub.f32 %v575_v33, %v608_v40  ;;  %v611_v42 = vpop.xlane.xlu1 %610  ;;  %v1181_v33 = vld [vmem:[#allocation5 + $0x68] sm:$0xff] }
 0x3c5   :  { %v613_v43 = vsub.f32 %v603_v34, %v611_v42  ;;  %v1180_v34 = vld [vmem:[#allocation5 + $0x60] sm:$0xff] }
 0x3c6   :  { %v1264_v44 = vpop.eup %1263  ;;  %v614_v45 = vmul.f32 1.442695, %v612_v41 }
 0x3c7   :  { %v616_v46 = vmul.f32 1.442695, %v613_v43  ;;  %v491_v47 = vsel %vm164_vm0, %v1264_v44, 0.0  ;;  %v1176_v43 = vld [vmem:[#allocation5 + $0x40] sm:$0xff] }
 0x3c8   :  { %1265 = vpow2.f32 %v614_v45  ;;  %492 = vadd.xlane.f32.xlu0 %v491_v47 }
 0x3c9   :  { %1267 = vpow2.f32 %v616_v46 }
 0x3ce   :  { %v1266_v48 = vpop.eup %1265 }
 0x3cf   :  { %v1268_v49 = vpop.eup %1267  ;;  %v618_v50 = vsel %vm164_vm0, %v1266_v48, 0.0 }
 0x3d0   :  { %619 = vadd.xlane.f32.xlu2 %v618_v50  ;;  %v621_v51 = vsel %vm164_vm0, %v1268_v49, 0.0  ;;  %v1191_v50 = vld [vmem:[#allocation5 + $0xb8] sm:$0xff] }
 0x3d1   :  { %622 = vadd.xlane.f32.xlu1 %v621_v51 }
 0x3dc   :  { %524 = vrot.lane.b32.xlu0 %v1487_v12, %s1425_s15 }
 0x3e8   :  { %1224 = vrot.lane.b32.xlu2 %v1515_v31, %s1428_s18 }
 0x3ea   :  { %1229 = vrot.lane.b32.xlu1 %v1228_v28, %s1416_s1 }
 0x43b   :  { %v493_v52 = vpop.xlane.xlu0 %492 }
 0x43c   :  { %1269 = vrcp.f32 %v493_v52  ;;  %v1190_v52 = vld [vmem:[#allocation5 + $0xb0] sm:$0xff] }
 0x442   :  { %v1270_v55 = vpop.eup %1269 }
 0x443   :  { %v620_v53 = vpop.xlane.xlu2 %619  ;;  %v497_v60 = vmul.f32 %v1270_v55, %v1264_v44 }
 0x444   :  { %v623_v54 = vpop.xlane.xlu1 %622 }
 0x445   :  { %1271 = vrcp.f32 %v623_v54 }
 0x446   :  { %1273 = vrcp.f32 %v620_v53 }
 0x44b   :  { %v1272_v56 = vpop.eup %1271  ;;  %v1225_v57 = vpop.permute.xlu2 %1224 }
 0x44c   :  { %v627_v58 = vmul.f32 %v1272_v56, %v1268_v49  ;;  %v1227_v59 = vunpack.i.h.bf16 %v1225_v57  ;;  %v1226_v12 = vunpack.i.l.bf16 %v1225_v57  ;;  %v1274_v31 = vpop.eup %1273  ;;  %v1189_v56 = vld [vmem:[#allocation5 + $0xa8] sm:$0xff] }
 0x44d   :  { %v626_v62 = vmul.f32 %v1274_v31, %v1266_v48 }
 0x44e   :  { %675 = vmatpush.msra.mxu3 %v1227_v59  ;;  %v525_v61 = vpop.permute.xlu0 %524  ;;  %v1188_v59 = vld [vmem:[#allocation5 + $0xa0] sm:$0xff] }
 0x44f   :  { %545 = vmatpush.msra.mxu2 %v525_v61  ;;  %1092 = vmatmul.msk.f32.vlgmr.msra.gmra.mxu3 %vm164_vm0, %v627_v58 }
 0x450   :  { %1086 = vmatmul.msk.f32.vlgmr.msra.gmra.mxu2 %vm164_vm0, %v497_v60 }
 0x451   :  { %649 = vmatpush.msrb.mxu2 %v1226_v12 }
 0x453   :  { %948 = vmatpush.bf16.msra.mxu2 %v1191_v50 }
 0x457   :  { %949 = vmatpush.bf16.msra.mxu2 %v1190_v52 }
 0x458   :  { %1091 = vmatmul.msk.f32.vlgmr.msrb.gmra.mxu2 %vm164_vm0, %v626_v62 }
 0x45b   :  { %950 = vmatpush.bf16.msra.mxu2 %v1189_v56 }
 0x45c   :  { %v1230_v6 = vpop.permute.xlu1 %1229 }
 0x45d   :  { %v1232_v7 = vunpack.i.h.bf16 %v1230_v6  ;;  %v1231_v10 = vunpack.i.l.bf16 %v1230_v6 }
 0x45f   :  { %v705_v16 = vsel %vm164_vm0, %v1548_v25, %v1232_v7  ;;  %v704_v17 = vsel %vm164_vm0, %v1546_v24, %v1231_v10  ;;  %951 = vmatpush.bf16.msra.mxu2 %v1188_v59 }
 0x4d2   :  { %v677_v1 = vpop.f32.mrf.mxu3 }
 0x4d3   :  { %v547_v63 = vpop.f32.mrf.mxu2 }
 0x4d4   :  { %v1233_v0 = vpack.i.bf16 %v547_v63, %v521_v30 }
 0x4d6   :  { %1234 = vrot.lane.b32.xlu0 %v1233_v0, %s1429_s19 }
 0x4db   :  { %v651_v2 = vpop.f32.mrf.mxu2 }
 0x4dc   :  { %v1238_v3 = vpack.i.bf16 %v677_v1, %v651_v2  ;;  %v1579_v1 = vld [vmem:[#allocation8] sm:$0xff] }
 0x4dd   :  { %v792_v5 = vperm.slane %v1579_v1, 2  ;;  %v899_v32 = vperm.slane %v1579_v1, 1 }
 0x4de   :  { %1239 = vrot.lane.b32.xlu2 %v1238_v3, %s1430_s20 }
 0x538   :  { %v1240_v11 = vpop.permute.xlu2 %1239 }
 0x539   :  { %v1242_v18 = vunpack.i.h.bf16 %v1240_v11  ;;  %v1241_v19 = vunpack.i.l.bf16 %v1240_v11 }
 0x548   :  { %v1235_v13 = vpop.permute.xlu0 %1234 }
 0x549   :  { %v1237_v14 = vunpack.i.h.bf16 %v1235_v13  ;;  %v1236_v15 = vunpack.i.l.bf16 %v1235_v13 }
 0x54b   :  { %v708_v20 = vsel %vm706_vm1, %v705_v16, %v1237_v14  ;;  %v707_v21 = vsel %vm706_vm1, %v704_v17, %v1236_v15  ;;  %v795_v14 = vperm.slane %v1579_v1, 3 }
 0x54c   :  { %v710_v22 = vsel %vm709_vm2, %v707_v21, %v1241_v19  ;;  %v711_v23 = vsel %vm709_vm2, %v708_v20, %v1242_v18  ;;  %v1187_v19 = vld [vmem:[#allocation5 + $0x98] sm:$0xff]  ;;  %v1186_v20 = vld [vmem:[#allocation5 + $0x90] sm:$0xff]  ;;  %v1185_v21 = vld [vmem:[#allocation5 + $0x88] sm:$0xff] }
 0x54d   :  { %v712_v26 = vpack.c.bf16 %v711_v23, %v710_v22  ;;  %952 = vmatpush.bf16.msra.mxu2 %v1187_v19  ;;  %v1184_v22 = vld [vmem:[#allocation5 + $0x80] sm:$0xff] }
 0x54f   :  { %1101 = vmatmul.msk.bf16.vlgmr.msrb.gmra.mxu1 %vm730_vm3, %v712_v26  ;;  %v816_v26 = vperm.slane %v1579_v1, 0 }
 0x551   :  { %953 = vmatpush.bf16.msra.mxu2 %v1186_v20 }
 0x555   :  { %954 = vmatpush.bf16.msra.mxu2 %v1185_v21 }
 0x559   :  { %955 = vmatpush.bf16.msra.mxu2 %v1184_v22 }
 0x5cc   :  { %v743_v27 = vpop.f32.mrf.mxu1 }
 0x5cd   :  { %v1568_v28 = vadd.f32 %v743_v27, %v1476_v8  ;;  %v1182_v8 = vld [vmem:[#allocation5 + $0x70] sm:$0xff] }
 0x5ce   :  { %866 = vmatpush.bf16.msrb.mxu0 %v1182_v8 }
 0x5cf   :  { %748 = vadd.xlane.f32.xlu0 %v1568_v28  ;;  %v754_v25 = vmul.f32 %v1568_v28, %v1568_v28 }
 0x5d1   :  { %756 = vadd.xlane.f32.xlu2 %v754_v25 }
 0x5d2   :  { %867 = vmatpush.bf16.msrb.mxu0 %v1181_v33 }
 0x5d4   :  { %v745_v24 = vpop.f32.mrf.mxu1 }
 0x5d5   :  { %v1574_v29 = vadd.f32 %v745_v24, %v1478_v9 }
 0x5d6   :  { %868 = vmatpush.bf16.msrb.mxu0 %v1180_v34 }
 0x5d7   :  { %750 = vadd.xlane.f32.xlu1 %v1574_v29  ;;  %v755_v30 = vmul.f32 %v1574_v29, %v1574_v29 }
 0x5d9   :  { %758 = vadd.xlane.f32.xlu0 %v755_v30 }
 0x5da   :  { %869 = vmatpush.bf16.msrb.mxu0 %v1179_v35 }
 0x5de   :  { %870 = vmatpush.bf16.msrb.mxu0 %v1178_v36 }
 0x5e2   :  { %871 = vmatpush.bf16.msrb.mxu0 %v1177_v39 }
 0x5e6   :  { %872 = vmatpush.bf16.msrb.mxu0 %v1176_v43 }
 0x642   :  { %v749_v37 = vpop.xlane.xlu0 %748 }
 0x643   :  { %v752_v9 = vmul.f32 0.03125, %v749_v37 }
 0x644   :  { %v757_v38 = vpop.xlane.xlu2 %756 }
 0x645   :  { %v762_v40 = vmul.f32 %v752_v9, %v752_v9  ;;  %v760_v41 = vmul.f32 0.03125, %v757_v38  ;;  %v766_v2 = vsub.f32 %v1568_v28, %v752_v9 }
 0x647   :  { %v764_v42 = vsub.f32 %v760_v41, %v762_v40 }
 0x649   :  { %v768_v44 = vadd.f32 1e-05, %v764_v42 }
 0x64a   :  { %v751_v45 = vpop.xlane.xlu1 %750 }
 0x64b   :  { %1275 = vrsqrt.f32 %v768_v44  ;;  %v753_v46 = vmul.f32 0.03125, %v751_v45  ;;  %vm776_vm5 = vweird.f32 %v768_v44 }
 0x64c   :  { %v759_v47 = vpop.xlane.xlu0 %758 }
 0x64d   :  { %v763_v48 = vmul.f32 %v753_v46, %v753_v46  ;;  %v761_v49 = vmul.f32 0.03125, %v759_v47  ;;  %v767_v7 = vsub.f32 %v1574_v29, %v753_v46 }
 0x64f   :  { %v765_v51 = vsub.f32 %v761_v49, %v763_v48 }
 0x651   :  { %v1276_v53 = vpop.eup %1275  ;;  %v769_v54 = vadd.f32 1e-05, %v765_v51 }
 0x652   :  { %v771_v55 = vmul.f32 %v1276_v53, %v768_v44  ;;  %vm777_vm4 = vweird.f32 %v1276_v53 }
 0x653   :  { %1277 = vrsqrt.f32 %v769_v54  ;;  %vm778_vm6 = vmor %vm776_vm5, %vm777_vm4  ;;  %vm786_vm8 = vweird.f32 %v769_v54 }
 0x654   :  { %v772_v57 = vmul.f32 %v1276_v53, %v771_v55 }
 0x656   :  { %v773_v58 = vmul.f32 0.5, %v772_v57 }
 0x658   :  { %v774_v60 = vsub.f32 1.5, %v773_v58 }
 0x659   :  { %v1278_v61 = vpop.eup %1277 }
 0x65a   :  { %v775_v12 = vmul.f32 %v1276_v53, %v774_v60  ;;  %v781_v31 = vmul.f32 %v1278_v61, %v769_v54  ;;  %vm787_vm7 = vweird.f32 %v1278_v61 }
 0x65b   :  { %vm788_vm9 = vmor %vm786_vm8, %vm787_vm7 }
 0x65c   :  { %v782_v62 = vmul.f32 %v1278_v61, %v781_v31  ;;  %v779_v63 = vsel %vm778_vm6, %v1276_v53, %v775_v12  ;;  %v1008_v12 = vperm.slane %v1579_v1, 4 }
 0x65d   :  { %v790_v4 = vmul.f32 %v779_v63, %v766_v2 }
 0x65e   :  { %v783_v0 = vmul.f32 0.5, %v782_v62 }
 0x65f   :  { %v793_v13 = vmul.f32 %v792_v5, %v790_v4 }
 0x660   :  { %v784_v3 = vsub.f32 1.5, %v783_v0  ;;  %v1011_v0 = vperm.slane %v1579_v1, 5 }
 0x661   :  { %v796_v16 = vadd.f32 %v795_v14, %v793_v13 }
 0x662   :  { %v785_v6 = vmul.f32 %v1278_v61, %v784_v3 }
 0x664   :  { %v789_v10 = vsel %vm788_vm9, %v1278_v61, %v785_v6 }
 0x665   :  { %v791_v11 = vmul.f32 %v789_v10, %v767_v7 }
 0x667   :  { %v794_v15 = vmul.f32 %v792_v5, %v791_v11 }
 0x669   :  { %v797_v17 = vadd.f32 %v795_v14, %v794_v15 }
 0x66b   :  { %v798_v18 = vpack.c.bf16 %v797_v17, %v796_v16 }
 0x66d   :  { %873 = vmatmul.bf16.vlgmr.msrb.gmra.mxu0 %v798_v18 }
 0x6ea   :  { %v874_v23 = vpop.f32.mrf.mxu0 }
 0x6eb   :  { %v875_v27 = vadd.f32 %v874_v23, %v816_v26 }
 0x6ed   :  { %v879_v24 = vmax.f32 %v875_v27, 0.0 }
 0x6f2   :  { %v876_v28 = vpop.f32.mrf.mxu0 }
 0x6f3   :  { %v877_v25 = vadd.f32 %v876_v28, %v816_v26 }
 0x6f5   :  { %v880_v29 = vmax.f32 %v877_v25, 0.0 }
 0x6f7   :  { %v881_v30 = vpack.c.bf16 %v880_v29, %v879_v24 }
 0x6f9   :  { %956 = vmatmul.bf16.vlgmr.msra.gmra.mxu2 %v881_v30 }
 0x77c   :  { %v957_v8 = vpop.f32.mrf.mxu2 }
 0x77d   :  { %v958_v33 = vadd.f32 %v957_v8, %v899_v32 }
 0x77f   :  { %v962_v34 = vadd.f32 %v958_v33, %v796_v16 }
 0x781   :  { %964 = vadd.xlane.f32.xlu1 %v962_v34  ;;  %v970_v35 = vmul.f32 %v962_v34, %v962_v34 }
 0x783   :  { %972 = vadd.xlane.f32.xlu0 %v970_v35 }
 0x784   :  { %v959_v36 = vpop.f32.mrf.mxu2 }
 0x785   :  { %v960_v37 = vadd.f32 %v959_v36, %v899_v32 }
 0x787   :  { %v963_v9 = vadd.f32 %v960_v37, %v797_v17 }
 0x789   :  { %966 = vadd.xlane.f32.xlu2 %v963_v9  ;;  %v971_v38 = vmul.f32 %v963_v9, %v963_v9 }
 0x78b   :  { %974 = vadd.xlane.f32.xlu1 %v971_v38 }
 0x7f4   :  { %v965_v39 = vpop.xlane.xlu1 %964 }
 0x7f5   :  { %v968_v40 = vmul.f32 0.03125, %v965_v39 }
 0x7f6   :  { %v973_v41 = vpop.xlane.xlu0 %972 }
 0x7f7   :  { %v978_v42 = vmul.f32 %v968_v40, %v968_v40  ;;  %v976_v43 = vmul.f32 0.03125, %v973_v41  ;;  %v982_v61 = vsub.f32 %v962_v34, %v968_v40 }
 0x7f9   :  { %v980_v44 = vsub.f32 %v976_v43, %v978_v42 }
 0x7fb   :  { %v984_v45 = vadd.f32 1e-05, %v980_v44 }
 0x7fc   :  { %v967_v46 = vpop.xlane.xlu2 %966 }
 0x7fd   :  { %1279 = vrsqrt.f32 %v984_v45  ;;  %v969_v47 = vmul.f32 0.03125, %v967_v46  ;;  %vm992_vm11 = vweird.f32 %v984_v45 }
 0x7fe   :  { %v975_v48 = vpop.xlane.xlu1 %974 }
 0x7ff   :  { %v979_v49 = vmul.f32 %v969_v47, %v969_v47  ;;  %v977_v50 = vmul.f32 0.03125, %v975_v48  ;;  %v983_v7 = vsub.f32 %v963_v9, %v969_v47 }
 0x801   :  { %v981_v51 = vsub.f32 %v977_v50, %v979_v49 }
 0x803   :  { %v1280_v52 = vpop.eup %1279  ;;  %v985_v53 = vadd.f32 1e-05, %v981_v51 }
 0x804   :  { %v987_v54 = vmul.f32 %v1280_v52, %v984_v45  ;;  %vm993_vm10 = vweird.f32 %v1280_v52 }
 0x805   :  { %1281 = vrsqrt.f32 %v985_v53  ;;  %vm994_vm12 = vmor %vm992_vm11, %vm993_vm10  ;;  %vm1002_vm14 = vweird.f32 %v985_v53 }
 0x806   :  { %v988_v55 = vmul.f32 %v1280_v52, %v987_v54 }
 0x808   :  { %v989_v56 = vmul.f32 0.5, %v988_v55 }
 0x80a   :  { %v990_v57 = vsub.f32 1.5, %v989_v56 }
 0x80b   :  { %v1282_v58 = vpop.eup %1281 }
 0x80c   :  { %v991_v59 = vmul.f32 %v1280_v52, %v990_v57  ;;  %v997_v60 = vmul.f32 %v1282_v58, %v985_v53  ;;  %vm1003_vm13 = vweird.f32 %v1282_v58 }
 0x80d   :  { %vm1004_vm15 = vmor %vm1002_vm14, %vm1003_vm13 }
 0x80e   :  { %v995_v31 = vsel %vm994_vm12, %v1280_v52, %v991_v59  ;;  %v998_v62 = vmul.f32 %v1282_v58, %v997_v60 }
 0x80f   :  { %v1006_v63 = vmul.f32 %v995_v31, %v982_v61 }
 0x810   :  { %v999_v2 = vmul.f32 0.5, %v998_v62 }
 0x811   :  { %v1009_v3 = vmul.f32 %v1008_v12, %v1006_v63 }
 0x812   :  { %v1000_v4 = vsub.f32 1.5, %v999_v2 }
 0x813   :  { %v1012_v5 = vadd.f32 %v1011_v0, %v1009_v3 }
 0x814   :  { %v1001_v6 = vmul.f32 %v1282_v58, %v1000_v4 }
 0x815   :  { %1014 = vst [vmem:[#allocation10] sm:$0xff] %v1012_v5 }
 0x816   :  { %v1005_v10 = vsel %vm1004_vm15, %v1282_v58, %v1001_v6 }
 0x817   :  { %v1007_v11 = vmul.f32 %v1005_v10, %v983_v7 }
 0x819   :  { %v1010_v13 = vmul.f32 %v1008_v12, %v1007_v11 }
 0x81b   :  { %v1013_v1 = vadd.f32 %v1011_v0, %v1010_v13 }
 0x81d   :  { %1015 = vst [vmem:[#allocation10 + $0x8] sm:$0xff] %v1013_v1 }
 0x81e   :  { %1028 = dma.vmem_to_hbm [thread:$0]  %s1021_s22, 256, %s1023_s25, [#allocation4], %s1415_s27, %s1415_s27, %s1416_s1  }
 0x81f   :  { %1409 = dma.done.wait [#allocation4], 256  }
 0x820   :  { %1410 = vsyncadd [#allocation4], 4294967040 }
 0x821   :  { %1033 = vsyncpa [#allocation3], 1 }
 0x822   :  { %1034 = vsyncpa [#allocation6], 1 }
 0x823   :  { %1035 = vsyncpa [#allocation9], 1 }
 0x824   :  { %1036 = vsyncpa [#allocation4], 1 }

</bundles_post_ra>
